<compile_context>
chip_gen: v6e
topology: v6e:2x2x1
jax: 0.10.0
libtpu: 0.0.40
codegen_flags: <defaults>
</compile_context>

<pallas_src>
import jax
import jax.numpy as jnp
from jax.experimental import pallas as pl
from jax.experimental.pallas import tpu as pltpu


def _make_kernel(kd, kh, kw, sh, sw, dh, dw, ho, wo, cin, cout_p):
    """Per-(batch, output-depth, depth-tap) conv kernel."""
    k2 = kh * kw * cin

    def kernel(x_ref, w_ref, b_ref, s_ref, o_ref, acc_ref, slab_ref):
        # x_ref:    (1, 1, Hp, Wp, Cin)        bf16  one padded depth slice
        # w_ref:    (kD, kh*kw*Cin, Cout_p)    bf16  (constant index -> 1 fetch)
        # b_ref:    (1, Cout_p)                f32   int32-valued bias
        # s_ref:    (1, Cout_p)                f32   per-channel requant scale
        # o_ref:    (1, 1, Ho*Wo, Cout_p)      int8  lane-dense output block
        # acc_ref:  (Ho*Wo, Cout_p)            f32   accumulator across kD axis
        # slab_ref: (Ho, Wo, kh*kw*Cin)        f32   per-step im2col slab
        ikd = pl.program_id(2)

        @pl.when(ikd == 0)
        def _init():
            # Fold the bias into the accumulator initialisation.
            acc_ref[...] = jnp.broadcast_to(b_ref[...], (ho * wo, cout_p))

        # Load the depth slice once and widen; all tap slicing below happens on
        # the f32 value (cheap, well-supported layouts).
        plane = x_ref[0, 0, :, :, :].astype(jnp.float32)   # (Hp, Wp, Cin)

        # Build the im2col slab for this depth tap; column order (ikh, ikw, c)
        # matches the weight reshape done in the wrapper.
        for ikh in range(kh):
            h0 = ikh * dh
            if sh == 1:
                rows = plane[h0:h0 + ho]
            else:
                rows = plane[h0:h0 + (ho - 1) * sh + 1:sh]
            for ikw in range(kw):
                w0 = ikw * dw
                if sw == 1:
                    patch = rows[:, w0:w0 + wo, :]
                else:
                    patch = rows[:, w0:w0 + (wo - 1) * sw + 1:sw, :]
                col = (ikh * kw + ikw) * cin
                slab_ref[:, :, col:col + cin] = patch

        # One MXU matmul per depth tap: (Ho*Wo, K) @ (K, Cout_p), K = kh*kw*cin.
        slab = slab_ref[...].reshape(ho * wo, k2).astype(jnp.bfloat16)
        acc_ref[...] += jnp.dot(slab, w_ref[ikd],
                                preferred_element_type=jnp.float32)

        @pl.when(ikd == kd - 1)
        def _finalize():
            out = jnp.round(acc_ref[...] * s_ref[...])   # per-channel requant
            out = jnp.clip(out, -128.0, 127.0)
            o_ref[0, 0] = out.astype(jnp.int8)

    return kernel


def quantized_conv3d(x_int8, weight_f, bias_f, *, weight_scale, input_scale,
                     out_scale, stride, padding, dilation, groups):
    """Quantized conv3d forward. Returns (int8 output in NCDHW, out_scale)."""
    assert groups == 1  # TODO(synk): grouped conv not implemented
    n, cin, d, h, w = x_int8.shape
    cout, cin_w, kd, kh, kw = weight_f.shape
    assert cin_w == cin
    sd, sh, sw = stride
    pd, ph, pw = padding
    dd, dh, dw = dilation

    # Parameter setup (glue): quantize weight per-out-channel, bias to int32
    # at scale input_scale * weight_scale.
    w_q = jnp.clip(
        jnp.round(weight_f / weight_scale[:, None, None, None, None]),
        -128, 127)
    bias_q = jnp.round(bias_f / (input_scale * weight_scale))
    requant = (input_scale * weight_scale / out_scale).astype(jnp.float32)

    # NCDHW -> NDHWC as bf16 (int8 values exact in bf16), zero pad
    # (padding_mode='zeros').
    x = jnp.transpose(x_int8, (0, 2, 3, 4, 1)).astype(jnp.bfloat16)
    x = jnp.pad(x, ((0, 0), (pd, pd), (ph, ph), (pw, pw), (0, 0)))
    dp, hp, wp = d + 2 * pd, h + 2 * ph, w + 2 * pw
    do = (dp - (dd * (kd - 1) + 1)) // sd + 1
    ho = (hp - (dh * (kh - 1) + 1)) // sh + 1
    wo = (wp - (dw * (kw - 1) + 1)) // sw + 1
    k2 = kh * kw * cin
    cout_p = ((cout + 127) // 128) * 128   # pad Cout to 128 -> lane-dense store

    # (Cout, Cin, kD, kH, kW) -> (kD, kH*kW*Cin, Cout_p) bf16, zero-padded.
    w_k = jnp.transpose(w_q, (2, 3, 4, 1, 0)).reshape(kd, k2, cout)
    w_k = jnp.pad(w_k, ((0, 0), (0, 0), (0, cout_p - cout))).astype(jnp.bfloat16)
    bias_k = jnp.pad(bias_q, (0, cout_p - cout)).reshape(1, cout_p)
    bias_k = bias_k.astype(jnp.float32)
    scale_k = jnp.pad(requant, (0, cout_p - cout),
                      constant_values=1.0).reshape(1, cout_p)

    kernel = _make_kernel(kd, kh, kw, sh, sw, dh, dw, ho, wo, cin, cout_p)

    out = pl.pallas_call(
        kernel,
        out_shape=jax.ShapeDtypeStruct((n, do, ho * wo, cout_p), jnp.int8),
        grid_spec=pltpu.PrefetchScalarGridSpec(
            num_scalar_prefetch=0,
            grid=(n, do, kd),
            in_specs=[
                # One padded depth slice per step (depth-tiled input).
                pl.BlockSpec((1, 1, hp, wp, cin),
                             lambda b, od, ikd: (b, od * sd + ikd * dd, 0, 0, 0)),
                # Whole (small) weight tensor, constant index -> single fetch.
                pl.BlockSpec((kd, k2, cout_p), lambda b, od, ikd: (0, 0, 0)),
                pl.BlockSpec((1, cout_p), lambda b, od, ikd: (0, 0)),
                pl.BlockSpec((1, cout_p), lambda b, od, ikd: (0, 0)),
            ],
            out_specs=pl.BlockSpec((1, 1, ho * wo, cout_p),
                                   lambda b, od, ikd: (b, od, 0, 0)),
            scratch_shapes=[
                pltpu.VMEM((ho * wo, cout_p), jnp.float32),   # accumulator
                pltpu.VMEM((ho, wo, k2), jnp.float32),        # im2col slab
            ],
        ),
        compiler_params=pltpu.CompilerParams(
            dimension_semantics=("parallel", "parallel", "arbitrary")),
    )(x, w_k, bias_k, scale_k)

    # (N, Do, Ho*Wo, Cout_p) -> NCDHW (PyTorch convention), drop channel pad.
    out = out.reshape(n, do, ho, wo, cout_p)[..., :cout]
    out_ncdhw = jnp.transpose(out, (0, 4, 1, 2, 3))
    return out_ncdhw, jnp.asarray(out_scale, jnp.float32)


if __name__ == "__main__":
    key = jax.random.PRNGKey(0)
    k1, k2, k3 = jax.random.split(key, 3)

    # Small shapes consistent with Conv3d(in=4, out=8, kernel_size=3,
    # stride=1, padding=1, dilation=1, groups=1, bias=True).
    N, CIN, COUT = 2, 4, 8
    D = H = W = 8
    KS = (3, 3, 3)
    stride = (1, 1, 1)
    padding = (1, 1, 1)
    dilation = (1, 1, 1)

    # Deterministic synthetic quantized input (symmetric int8, zp = 0).
    x_int8 = jax.random.randint(
        k1, (N, CIN, D, H, W), -128, 128, jnp.int32).astype(jnp.int8)
    input_scale = jnp.float32(0.05)

    # Deterministic synthetic parameters (module buffers are float weight,
    # per-channel weight_scale, float bias, scalar out_scale).
    weight = jax.random.normal(k2, (COUT, CIN) + KS, jnp.float32) * 0.1
    weight_scale = jnp.max(jnp.abs(weight), axis=(1, 2, 3, 4)) / 127.0
    bias = jax.random.normal(k3, (COUT,), jnp.float32) * 0.5
    out_scale = jnp.float32(0.1)

    out, oscale = quantized_conv3d(
        x_int8, weight, bias,
        weight_scale=weight_scale, input_scale=input_scale,
        out_scale=out_scale, stride=stride, padding=padding,
        dilation=dilation, groups=1)
    out = jax.block_until_ready(out)

    # Pure-JAX reference (same quantization arithmetic).
    w_q = jnp.clip(
        jnp.round(weight / weight_scale[:, None, None, None, None]), -128, 127)
    bias_q = jnp.round(bias / (input_scale * weight_scale))
    acc = jax.lax.conv_general_dilated(
        x_int8.astype(jnp.float32), w_q,
        window_strides=stride, padding=[(p, p) for p in padding],
        rhs_dilation=dilation,
        dimension_numbers=("NCDHW", "OIDHW", "NCDHW"))
    requant = input_scale * weight_scale / out_scale
    ref = jnp.clip(
        jnp.round((acc + bias_q[None, :, None, None, None]) *
                  requant[None, :, None, None, None]),
        -128, 127).astype(jnp.int8)

    assert out.shape == ref.shape == (N, COUT, D, H, W)
    assert out.dtype == jnp.int8
    assert bool(jnp.array_equal(out, ref))
    print("KERNEL_OK")
</pallas_src>

<mosaic_0001>
module attributes {stable_mosaic.version = 11 : i64} {
  func.func @kernel(%arg0: i32, %arg1: i32, %arg2: i32, %arg3: memref<1x1x10x10x4xbf16, #tpu.memory_space<vmem>>, %arg4: memref<3x36x128xbf16, #tpu.memory_space<vmem>>, %arg5: memref<1x128xf32, #tpu.memory_space<vmem>>, %arg6: memref<1x128xf32, #tpu.memory_space<vmem>>, %arg7: memref<1x1x64x128xi8, #tpu.memory_space<vmem>>, %arg8: memref<64x128xf32, #tpu.memory_space<vmem>>, %arg9: memref<8x8x36xf32, #tpu.memory_space<vmem>>) attributes {dimension_semantics = [#tpu.dimension_semantics<parallel>, #tpu.dimension_semantics<parallel>, #tpu.dimension_semantics<arbitrary>], iteration_bounds = array<i64: 2, 8, 3>, scalar_prefetch = 0 : i64, scratch_operands = 2 : i64, tpu.core_type = #tpu.core_type<tc>, window_params = [{transform_indices = @transform_0, window_bounds = array<i64: 1, 1, 10, 10, 4>}, {pipeline_mode = #tpu.pipeline_mode<synchronous>, transform_indices = @transform_1, window_bounds = array<i64: 3, 36, 128>}, {pipeline_mode = #tpu.pipeline_mode<synchronous>, transform_indices = @transform_2, window_bounds = array<i64: 1, 128>}, {pipeline_mode = #tpu.pipeline_mode<synchronous>, transform_indices = @transform_3, window_bounds = array<i64: 1, 128>}, {transform_indices = @transform_4, window_bounds = array<i64: 1, 1, 64, 128>}]} {
    %c0_i32 = arith.constant 0 : i32
    %0 = arith.cmpi eq, %arg2, %c0_i32 : i32
    %1 = arith.extui %0 : i1 to i32
    %c0_i32_0 = arith.constant 0 : i32
    %2 = arith.cmpi ne, %1, %c0_i32_0 : i32
    scf.if %2 {
      %c0_34 = arith.constant 0 : index
      %c0_35 = arith.constant 0 : index
      %40 = vector.load %arg5[%c0_34, %c0_35] : memref<1x128xf32, #tpu.memory_space<vmem>>, vector<1x128xf32>
      %41 = vector.shape_cast %40 : vector<1x128xf32> to vector<1x128xf32>
      %42 = vector.broadcast %41 : vector<1x128xf32> to vector<64x128xf32>
      %c0_36 = arith.constant 0 : index
      %c0_37 = arith.constant 0 : index
      %43 = vector.load %arg8[%c0_36, %c0_37] : memref<64x128xf32, #tpu.memory_space<vmem>>, vector<64x128xf32>
      tpu.vector_store %arg8[%c0_36, %c0_37], %42 {strides = array<i32>} : memref<64x128xf32, #tpu.memory_space<vmem>>, vector<64x128xf32>,
    } else {
    }
    %c0 = arith.constant 0 : index
    %c0_1 = arith.constant 0 : index
    %c0_2 = arith.constant 0 : index
    %c0_3 = arith.constant 0 : index
    %c0_4 = arith.constant 0 : index
    %3 = vector.load %arg3[%c0, %c0_1, %c0_2, %c0_3, %c0_4] : memref<1x1x10x10x4xbf16, #tpu.memory_space<vmem>>, vector<1x1x10x10x4xbf16>
    %4 = vector.shape_cast %3 : vector<1x1x10x10x4xbf16> to vector<10x10x4xbf16>
    %5 = arith.extf %4 : vector<10x10x4xbf16> to vector<10x10x4xf32>
    %6 = vector.extract_strided_slice %5 {offsets = [0, 0, 0], sizes = [8, 10, 4], strides = [1, 1, 1]} : vector<10x10x4xf32> to vector<8x10x4xf32>
    %7 = vector.extract_strided_slice %6 {offsets = [0, 0, 0], sizes = [8, 8, 4], strides = [1, 1, 1]} : vector<8x10x4xf32> to vector<8x8x4xf32>
    %c0_5 = arith.constant 0 : index
    %c0_6 = arith.constant 0 : index
    %c0_7 = arith.constant 0 : index
    %8 = vector.load %arg9[%c0_5, %c0_6, %c0_7] : memref<8x8x36xf32, #tpu.memory_space<vmem>>, vector<8x8x4xf32>
    tpu.vector_store %arg9[%c0_5, %c0_6, %c0_7], %7 {strides = array<i32>} : memref<8x8x36xf32, #tpu.memory_space<vmem>>, vector<8x8x4xf32>,
    %9 = vector.extract_strided_slice %6 {offsets = [0, 1, 0], sizes = [8, 8, 4], strides = [1, 1, 1]} : vector<8x10x4xf32> to vector<8x8x4xf32>
    %c0_8 = arith.constant 0 : index
    %c0_9 = arith.constant 0 : index
    %c4 = arith.constant 4 : index
    %10 = vector.load %arg9[%c0_8, %c0_9, %c4] : memref<8x8x36xf32, #tpu.memory_space<vmem>>, vector<8x8x4xf32>
    tpu.vector_store %arg9[%c0_8, %c0_9, %c4], %9 {strides = array<i32>} : memref<8x8x36xf32, #tpu.memory_space<vmem>>, vector<8x8x4xf32>,
    %11 = vector.extract_strided_slice %6 {offsets = [0, 2, 0], sizes = [8, 8, 4], strides = [1, 1, 1]} : vector<8x10x4xf32> to vector<8x8x4xf32>
    %c0_10 = arith.constant 0 : index
    %c0_11 = arith.constant 0 : index
    %c8 = arith.constant 8 : index
    %12 = vector.load %arg9[%c0_10, %c0_11, %c8] : memref<8x8x36xf32, #tpu.memory_space<vmem>>, vector<8x8x4xf32>
    tpu.vector_store %arg9[%c0_10, %c0_11, %c8], %11 {strides = array<i32>} : memref<8x8x36xf32, #tpu.memory_space<vmem>>, vector<8x8x4xf32>,
    %13 = vector.extract_strided_slice %5 {offsets = [1, 0, 0], sizes = [8, 10, 4], strides = [1, 1, 1]} : vector<10x10x4xf32> to vector<8x10x4xf32>
    %14 = vector.extract_strided_slice %13 {offsets = [0, 0, 0], sizes = [8, 8, 4], strides = [1, 1, 1]} : vector<8x10x4xf32> to vector<8x8x4xf32>
    %c0_12 = arith.constant 0 : index
    %c0_13 = arith.constant 0 : index
    %c12 = arith.constant 12 : index
    %15 = vector.load %arg9[%c0_12, %c0_13, %c12] : memref<8x8x36xf32, #tpu.memory_space<vmem>>, vector<8x8x4xf32>
    tpu.vector_store %arg9[%c0_12, %c0_13, %c12], %14 {strides = array<i32>} : memref<8x8x36xf32, #tpu.memory_space<vmem>>, vector<8x8x4xf32>,
    %16 = vector.extract_strided_slice %13 {offsets = [0, 1, 0], sizes = [8, 8, 4], strides = [1, 1, 1]} : vector<8x10x4xf32> to vector<8x8x4xf32>
    %c0_14 = arith.constant 0 : index
    %c0_15 = arith.constant 0 : index
    %c16 = arith.constant 16 : index
    %17 = vector.load %arg9[%c0_14, %c0_15, %c16] : memref<8x8x36xf32, #tpu.memory_space<vmem>>, vector<8x8x4xf32>
    tpu.vector_store %arg9[%c0_14, %c0_15, %c16], %16 {strides = array<i32>} : memref<8x8x36xf32, #tpu.memory_space<vmem>>, vector<8x8x4xf32>,
    %18 = vector.extract_strided_slice %13 {offsets = [0, 2, 0], sizes = [8, 8, 4], strides = [1, 1, 1]} : vector<8x10x4xf32> to vector<8x8x4xf32>
    %c0_16 = arith.constant 0 : index
    %c0_17 = arith.constant 0 : index
    %c20 = arith.constant 20 : index
    %19 = vector.load %arg9[%c0_16, %c0_17, %c20] : memref<8x8x36xf32, #tpu.memory_space<vmem>>, vector<8x8x4xf32>
    tpu.vector_store %arg9[%c0_16, %c0_17, %c20], %18 {strides = array<i32>} : memref<8x8x36xf32, #tpu.memory_space<vmem>>, vector<8x8x4xf32>,
    %20 = vector.extract_strided_slice %5 {offsets = [2, 0, 0], sizes = [8, 10, 4], strides = [1, 1, 1]} : vector<10x10x4xf32> to vector<8x10x4xf32>
    %21 = vector.extract_strided_slice %20 {offsets = [0, 0, 0], sizes = [8, 8, 4], strides = [1, 1, 1]} : vector<8x10x4xf32> to vector<8x8x4xf32>
    %c0_18 = arith.constant 0 : index
    %c0_19 = arith.constant 0 : index
    %c24 = arith.constant 24 : index
    %22 = vector.load %arg9[%c0_18, %c0_19, %c24] : memref<8x8x36xf32, #tpu.memory_space<vmem>>, vector<8x8x4xf32>
    tpu.vector_store %arg9[%c0_18, %c0_19, %c24], %21 {strides = array<i32>} : memref<8x8x36xf32, #tpu.memory_space<vmem>>, vector<8x8x4xf32>,
    %23 = vector.extract_strided_slice %20 {offsets = [0, 1, 0], sizes = [8, 8, 4], strides = [1, 1, 1]} : vector<8x10x4xf32> to vector<8x8x4xf32>
    %c0_20 = arith.constant 0 : index
    %c0_21 = arith.constant 0 : index
    %c28 = arith.constant 28 : index
    %24 = vector.load %arg9[%c0_20, %c0_21, %c28] : memref<8x8x36xf32, #tpu.memory_space<vmem>>, vector<8x8x4xf32>
    tpu.vector_store %arg9[%c0_20, %c0_21, %c28], %23 {strides = array<i32>} : memref<8x8x36xf32, #tpu.memory_space<vmem>>, vector<8x8x4xf32>,
    %25 = vector.extract_strided_slice %20 {offsets = [0, 2, 0], sizes = [8, 8, 4], strides = [1, 1, 1]} : vector<8x10x4xf32> to vector<8x8x4xf32>
    %c0_22 = arith.constant 0 : index
    %c0_23 = arith.constant 0 : index
    %c32 = arith.constant 32 : index
    %26 = vector.load %arg9[%c0_22, %c0_23, %c32] : memref<8x8x36xf32, #tpu.memory_space<vmem>>, vector<8x8x4xf32>
    tpu.vector_store %arg9[%c0_22, %c0_23, %c32], %25 {strides = array<i32>} : memref<8x8x36xf32, #tpu.memory_space<vmem>>, vector<8x8x4xf32>,
    %c0_24 = arith.constant 0 : index
    %c0_25 = arith.constant 0 : index
    %c0_26 = arith.constant 0 : index
    %27 = vector.load %arg9[%c0_24, %c0_25, %c0_26] : memref<8x8x36xf32, #tpu.memory_space<vmem>>, vector<8x8x36xf32>
    %28 = vector.shape_cast %27 : vector<8x8x36xf32> to vector<64x36xf32>
    %29 = arith.truncf %28 : vector<64x36xf32> to vector<64x36xbf16>
    %c0_27 = arith.constant 0 : index
    %c0_28 = arith.constant 0 : index
    %30 = vector.load %arg8[%c0_27, %c0_28] : memref<64x128xf32, #tpu.memory_space<vmem>>, vector<64x128xf32>
    %31 = arith.index_cast %arg2 : i32 to index
    %c0_29 = arith.constant 0 : index
    %c0_30 = arith.constant 0 : index
    %32 = vector.load %arg4[%31, %c0_29, %c0_30] : memref<3x36x128xbf16, #tpu.memory_space<vmem>>, vector<1x36x128xbf16>
    %33 = vector.shape_cast %32 : vector<1x36x128xbf16> to vector<36x128xbf16>
    %cst = arith.constant dense<0.000000e+00> : vector<64x128xf32>
    %34 = tpu.matmul %29, %33, %cst {dimension_numbers = #tpu.dot_dimension_numbers<[1], [0], [0], [1], [0, 0, 1, 1], [], []>} : vector<64x36xbf16>, vector<36x128xbf16>, vector<64x128xf32> -> vector<64x128xf32>
    %35 = arith.addf %30, %34 : vector<64x128xf32>
    %c0_31 = arith.constant 0 : index
    %c0_32 = arith.constant 0 : index
    %36 = vector.load %arg8[%c0_31, %c0_32] : memref<64x128xf32, #tpu.memory_space<vmem>>, vector<64x128xf32>
    tpu.vector_store %arg8[%c0_31, %c0_32], %35 {strides = array<i32>} : memref<64x128xf32, #tpu.memory_space<vmem>>, vector<64x128xf32>,
    %c2_i32 = arith.constant 2 : i32
    %37 = arith.cmpi eq, %arg2, %c2_i32 : i32
    %38 = arith.extui %37 : i1 to i32
    %c0_i32_33 = arith.constant 0 : i32
    %39 = arith.cmpi ne, %38, %c0_i32_33 : i32
    scf.if %39 {
      %c0_34 = arith.constant 0 : index
      %c0_35 = arith.constant 0 : index
      %40 = vector.load %arg8[%c0_34, %c0_35] : memref<64x128xf32, #tpu.memory_space<vmem>>, vector<64x128xf32>
      %c0_36 = arith.constant 0 : index
      %c0_37 = arith.constant 0 : index
      %41 = vector.load %arg6[%c0_36, %c0_37] : memref<1x128xf32, #tpu.memory_space<vmem>>, vector<1x128xf32>
      %42 = vector.broadcast %41 : vector<1x128xf32> to vector<64x128xf32>
      %43 = arith.mulf %40, %42 : vector<64x128xf32>
      %44 = math.roundeven %43 : vector<64x128xf32>
      %cst_38 = arith.constant -1.280000e+02 : f32
      %cst_39 = arith.constant 1.270000e+02 : f32
      %45 = vector.broadcast %cst_38 : f32 to vector<64x128xf32>
      %46 = arith.maximumf %45, %44 : vector<64x128xf32>
      %47 = vector.broadcast %cst_39 : f32 to vector<64x128xf32>
      %48 = arith.minimumf %47, %46 : vector<64x128xf32>
      %49 = arith.fptosi %48 : vector<64x128xf32> to vector<64x128xi8>
      %c0_40 = arith.constant 0 : index
      %c0_41 = arith.constant 0 : index
      %c0_42 = arith.constant 0 : index
      %c0_43 = arith.constant 0 : index
      %50 = vector.load %arg7[%c0_40, %c0_41, %c0_42, %c0_43] : memref<1x1x64x128xi8, #tpu.memory_space<vmem>>, vector<1x1x64x128xi8>
      %51 = vector.shape_cast %50 : vector<1x1x64x128xi8> to vector<64x128xi8>
      %52 = vector.shape_cast %49 : vector<64x128xi8> to vector<1x1x64x128xi8>
      tpu.vector_store %arg7[%c0_40, %c0_41, %c0_42, %c0_43], %52 {strides = array<i32>} : memref<1x1x64x128xi8, #tpu.memory_space<vmem>>, vector<1x1x64x128xi8>,
    } else {
    }
    return
  }
  func.func @transform_0(%arg0: i32, %arg1: i32, %arg2: i32) -> (i32, i32, i32, i32, i32) {
    %c1_i32 = arith.constant 1 : i32
    %0 = arith.muli %arg1, %c1_i32 : i32
    %c1_i32_0 = arith.constant 1 : i32
    %1 = arith.muli %arg2, %c1_i32_0 : i32
    %2 = arith.addi %0, %1 : i32
    %c0_i32 = arith.constant 0 : i32
    %c0_i32_1 = arith.constant 0 : i32
    %c0_i32_2 = arith.constant 0 : i32
    %c0_i32_3 = arith.constant 0 : i32
    return %arg0, %2, %c0_i32, %c0_i32_1, %c0_i32_2 : i32, i32, i32, i32, i32
  }
  func.func @transform_1(%arg0: i32, %arg1: i32, %arg2: i32) -> (i32, i32, i32) {
    %c0_i32 = arith.constant 0 : i32
    %c0_i32_0 = arith.constant 0 : i32
    %c0_i32_1 = arith.constant 0 : i32
    %c0_i32_2 = arith.constant 0 : i32
    return %c0_i32, %c0_i32_0, %c0_i32_1 : i32, i32, i32
  }
  func.func @transform_2(%arg0: i32, %arg1: i32, %arg2: i32) -> (i32, i32) {
    %c0_i32 = arith.constant 0 : i32
    %c0_i32_0 = arith.constant 0 : i32
    %c0_i32_1 = arith.constant 0 : i32
    return %c0_i32, %c0_i32_0 : i32, i32
  }
  func.func @transform_3(%arg0: i32, %arg1: i32, %arg2: i32) -> (i32, i32) {
    %c0_i32 = arith.constant 0 : i32
    %c0_i32_0 = arith.constant 0 : i32
    %c0_i32_1 = arith.constant 0 : i32
    return %c0_i32, %c0_i32_0 : i32, i32
  }
  func.func @transform_4(%arg0: i32, %arg1: i32, %arg2: i32) -> (i32, i32, i32, i32) {
    %c0_i32 = arith.constant 0 : i32
    %c0_i32_0 = arith.constant 0 : i32
    %c0_i32_1 = arith.constant 0 : i32
    return %arg0, %arg1, %c0_i32, %c0_i32_0 : i32, i32, i32, i32
  }
}

</mosaic_0001>

<bundles_post_ra>
// kernel: tpu_custom_call.1
= control target key start
LH: loop header
LB: loop body
LE: loop exit
PB: predicated region body
PF: predicated region fallthrough
CT: control target
= control target key end

     0   :  { %9 = vsyncpa [#allocation5], 0  ;;  %s2163_s0 = inlined_call_operand.vmem [shape: bf16[2,10,10,10,4], index: 0, kind: input, shape index: {}]   ;;  %s2164_s1 = inlined_call_operand.vmem [shape: bf16[3,36,128], index: 1, kind: input, shape index: {}]   ;;  %s2165_s2 = inlined_call_operand.vmem [shape: f32[1,128], index: 2, kind: input, shape index: {}]   ;;  %s2166_s3 = inlined_call_operand.vmem [shape: f32[1,128], index: 3, kind: input, shape index: {}]   ;;  %s2167_s4 = inlined_call_operand.hbm [shape: s8[2,8,64,128], index: 4, kind: output, shape index: {}]  }
   0x1   :  { %11 = vsyncpa [#allocation5 + $0x1], 0  ;;  %s1751_s15 = smov 0   ;;  %s1753_s16 = smov 0  }
   0x2   :  { %s1755_s17 = smov 0   ;;  %s1757_s18 = smov 0  }
   0x3   :  { %s1759_s19 = smov 0   ;;  %s1761_s20 = smov 0  }
   0x4   :  { %s1763_s21 = smov 0   ;;  %s1765_s22 = smov 0  }
   0x5   :  { %s1767_s23 = smov 0   ;;  %s1769_s24 = smov 0  }
   0x6 LB: > { %s1122_s25 = sadd.s32 4294967295, %s1714_s24   ;;  %s1123_s26 = sadd.s32 4294967294, %s1714_s24   ;;  %s1714_s24 = sphi %s1769_s24, %s17_s24   ;;  %s1710_s23 = sphi %s1767_s23, %s2188_s23   ;;  %s1706_s22 = sphi %s1765_s22, %s2187_s22   ;;  %s1702_s21 = sphi %s1763_s21, %s2186_s21   ;;  %s1698_s20 = sphi %s1761_s20, %s2185_s20   ;;  %s1694_s19 = sphi %s1759_s19, %s2184_s19   ;;  %s1690_s18 = sphi %s1757_s18, %s2183_s18   ;;  %s1686_s17 = sphi %s1755_s17, %s2182_s17   ;;  %s1682_s16 = sphi %s1753_s16, %s2181_s16   ;;  %s1678_s15 = sphi %s1751_s15, %s2180_s15  }
   0x7   : > { %s29_s27 = sadd.s32 1, %s1702_s21  ;;  %s32_s28 = sadd.s32 1, %s1706_s22 }
   0x8   : > { %p30_p0 = scmp.ge.s32.totalorder %s29_s27, 3  ;;  %s36_s29 = sadd.s32 1, %s1710_s23 }
   0x9   : > { %p148_p1 = scmp.ne.s32.totalorder %s1686_s17, %s1682_s16  ;;  %p149_p2 = scmp.eq.s32.totalorder %s1122_s25, 47 }
   0xa   : > { %s2190_s27 = smov (%p30_p0, %s29_s27), 0  ;;  %s2192_s28 = smov (!%p30_p0, %s32_s28), %s1706_s22 }
   0xb   : > { %2171 = sst [smem:[#allocation7_spill]] %s2190_s27  ;;  %p154_p3 = scmp.ne.s32.totalorder %s1682_s16, %s1678_s15 }
   0xc   : > { %p34_p4 = scmp.ge.s32.totalorder %s2192_s28, 8  ;;  %p155_p5 = scmp.eq.s32.totalorder %s1123_s26, 47 }
   0xd   : > { %p1813_p6 = por %p149_p2, %p148_p1  ;;  %p1126_p8 = scmp.ge.s32.totalorder %s1714_s24, 1 }
   0xe   : > { %s2194_s28 = smov (%p34_p4, %s2192_s28), 0  ;;  %s2196_s29 = smov (!%p34_p4, %s36_s29), %s1710_s23 }
   0xf   : > { %2173 = sst [smem:[#allocation8_spill]] %s2194_s28  ;;  %p1820_p7 = por %p155_p5, %p154_p3 }
  0x10   : > { %p38_p9 = scmp.ge.s32.totalorder %s2196_s29, 2  ;;  %p196_p10 = scmp.lt.s32.totalorder %s1714_s24, 49 }
  0x11   : > { %s134_s6 = ssub.s32 %s1706_s22, %s2194_s28  ;;  %s138_s9 = sadd.s32 1, %s1686_s17 }
  0x12   : > { %s2198_s29 = smov (%p38_p9, %s2196_s29), 0  ;;  %p197_p11 = pnand %p1126_p8, %p196_p10 }
  0x13   : > { %2175 = sst [smem:[#allocation9_spill]] %s2198_s29  ;;  %s133_s7 = ssub.s32 %s1710_s23, %s2198_s29 }
  0x14   : > { %s135_s8 = sor.u32 %s134_s6, %s133_s7  ;;  %200 = sbr.rel (%p197_p11) target bundleno = 528 (0x210), region = 36 }
  0x15   : > { %p136_p12 = scmp.eq.s32.totalorder %s135_s8, 0  ;;  %s2170_s11 = sand.u32 (!%p197_p11), 1, %s1682_s16  }
  0x16   : > { %s227_s12 = sadd.s32 (!%p197_p11), %s1690_s18, %s1694_s19  ;;  %s1127_s13 = sshll.u32 (!%p197_p11), %s2170_s11, 4 }
  0x17   : > { %s1834_s10 = scalar_select %p136_p12, %s1686_s17, %s138_s9  }
  0x18   : > { %p228_p13 = scmp.lt.s32.totalorder (!%p197_p11), %s1698_s20, 1  ;;  %p230_p0 = scmp.lt.s32.totalorder (!%p197_p11), %s227_s12, 9 }
  0x19   : > { %s1848_s28 = scalar_lea.vmem [#allocation4], %s1127_s13  ;;  %p1129_p1 = scmp.ne.s32.totalorder %s1690_s18, 0 }
  0x1a   : > { %s229_s14 = scalar_select %p228_p13, %s1698_s20, 1 }
  0x1b   : > { %s2200_s12 = smov (!%p230_p0, %s227_s12), 9 }
  0x1c   : > { %s1202_s25 = smul.u32 200, %s229_s14 }
  0x1d   : > { %s1201_s26 = smul.u32 20, %s2200_s12 }
  0x1e   : > { %242 = sbr.rel (%p1129_p1) target bundleno = 40 (0x28), region = 40 }
  0x1f   : > { %s234_s6 = sadd.s32 %s1202_s25, %s1201_s26 }
  0x20   : > { %s1128_s7 = sshll.u32 %s234_s6, 2 }
  0x21   : > { %s1846_s29 = scalar_lea.vmem %s2163_s0, %s1128_s7 }
  0x23   : > { %v1130_v0 = vld [vmem:[%s2165_s2] ss:$0 sm:$0xff] }
  0x24   : > { %250 = vst [vmem:[#allocation2 + $0x30] sm:$0xff] %v1130_v0  ;;  %251 = vst [vmem:[#allocation2] sm:$0xff] %v1130_v0 }
  0x25   : > { %252 = vst [vmem:[#allocation2 + $0x18] sm:$0xff] %v1130_v0  ;;  %253 = vst [vmem:[#allocation2 + $0x10] sm:$0xff] %v1130_v0 }
  0x26   : > { %254 = vst [vmem:[#allocation2 + $0x8] sm:$0xff] %v1130_v0  ;;  %255 = vst [vmem:[#allocation2 + $0x20] sm:$0xff] %v1130_v0 }
  0x27   : > { %256 = vst [vmem:[#allocation2 + $0x28] sm:$0xff] %v1130_v0  ;;  %257 = vst [vmem:[#allocation2 + $0x38] sm:$0xff] %v1130_v0 }
  0x28 PF: > { %v266_v1 = vld [vmem:[%s1846_s29 + $0x20] ss:$8 sps:$4 sm:$0xff]   ;;  %v267_v2 = vld [vmem:[%s1846_s29 + $0x24] sm:$0x1]  ;;  %v269_v7 = vld [vmem:[%s1846_s29 + $0x2c] sm:$0x1] }
  0x29   : > { %v1856_v3 = vunpack.c.l.bf16 %v266_v1  ;;  %v287_v4 = vunpack.c.l.bf16 %v267_v2  ;;  %v258_v5 = vld [vmem:[%s1846_s29] ss:$8 sps:$4 sm:$0xff]   ;;  %v259_v6 = vld [vmem:[%s1846_s29 + $0x4] sm:$0x1]  ;;  %v1861_v8 = vunpack.c.h.bf16 %v266_v1  ;;  %v289_v11 = vunpack.c.l.bf16 %v269_v7  ;;  %v261_v12 = vld [vmem:[%s1846_s29 + $0xc] sm:$0x1] }
  0x2a   : > { %v278_v9 = vunpack.c.l.bf16 %v258_v5  ;;  %v279_v10 = vunpack.c.l.bf16 %v259_v6  ;;  %v280_v13 = vunpack.c.h.bf16 %v258_v5  ;;  %v264_v14 = vld [vmem:[%s1846_s29 + $0x10] ss:$8 sps:$4 sm:$0xff]   ;;  %v265_v15 = vld [vmem:[%s1846_s29 + $0x1c] sm:$0x1]  ;;  %v281_v17 = vunpack.c.l.bf16 %v261_v12  ;;  %v263_v18 = vld [vmem:[%s1846_s29 + $0x14] sm:$0x1] }
  0x2b   : > { %v1867_v16 = vpack.i.bf16 %v287_v4, %v1856_v3  ;;  %s1716_s27 = smov 4   ;;  %v1872_v20 = vpack.i.bf16 %v289_v11, %v1861_v8  ;;  %v1874_v21 = vunpack.c.h.bf16 %v264_v14  ;;  %v285_v22 = vunpack.c.l.bf16 %v265_v15  ;;  %v272_v26 = vld [vmem:[%s1846_s29 + $0x30] ss:$8 sps:$4 sm:$0xff]   ;;  %v273_v27 = vld [vmem:[%s1846_s29 + $0x3c] sm:$0x1]  ;;  %s1717_s11 = smov 8  }
  0x2c   : > { %v1323_v19 = vpack.i.bf16 %v279_v10, %v278_v9  ;;  %v1876_v23 = vpack.i.bf16 %v281_v17, %v280_v13  ;;  %v1878_v24 = vunpack.c.l.bf16 %v264_v14  ;;  %v283_v25 = vunpack.c.l.bf16 %v263_v18  ;;  %v271_v28 = vld [vmem:[%s1846_s29 + $0x34] sm:$0x1]  ;;  %v274_v39 = vld [vmem:[%s1846_s29 + $0x40] ss:$8 sps:$4 sm:$0xff]   ;;  %s1718_s12 = smov 12   ;;  %s1719_s13 = smov 16  }
  0x2d   : > { %1334 = vrot.lane.b32.xlu1 %v1867_v16, %s1716_s27  ;;  %v1885_v29 = vpack.i.bf16 %v285_v22, %v1874_v21  ;;  %v1887_v30 = vunpack.c.h.bf16 %v272_v26  ;;  %v293_v31 = vunpack.c.l.bf16 %v273_v27  ;;  %v1893_v33 = vunpack.c.l.bf16 %v272_v26  ;;  %v275_v45 = vld [vmem:[%s1846_s29 + $0x44] sm:$0x1]  ;;  %s1720_s14 = smov 20   ;;  %s1721_s25 = smov 24   ;;  %v277_v51 = vld [vmem:[%s1846_s29 + $0x4c] sm:$0x1] }
  0x2e   : > { %1324 = vrot.lane.b32.xlu0 %v1323_v19, %s1716_s27  ;;  %v1891_v32 = vpack.i.bf16 %v283_v25, %v1878_v24  ;;  %v291_v34 = vunpack.c.l.bf16 %v271_v28  ;;  %v1503_v37 = vpack.i.bf16 %v1874_v21, %v1878_v24  ;;  %v1513_v38 = vpack.i.bf16 %v1861_v8, %v1856_v3  ;;  %s1722_s26 = smov 28   ;;  %s1171_s6 = smul.u32 20, %s1690_s18 }
  0x2f   : > { %v1897_v35 = vpack.i.bf16 %v293_v31, %v1887_v30  ;;  %vm298_vm0 = vcmask 31744   ;;  %v1408_v40 = vpack.i.bf16 %v1893_v33, %v1861_v8  ;;  %v294_v41 = vunpack.c.l.bf16 %v274_v39  ;;  %s1723_s29 = smov 32   ;;  %p1139_p2 = scmp.ne.s32.totalorder %s1690_s18, 2 }
  0x30   : > { %v1901_v36 = vpack.i.bf16 %v291_v34, %v1893_v33  ;;  %303 = vst.msk [vmem:[#allocation3 + $0x20] sm:$0xff] %vm298_vm0, %v1856_v3  ;;  %299 = vst.msk [vmem:[#allocation3] sm:$0xff] %vm298_vm0, %v278_v9  ;;  %v1403_v42 = vpack.i.bf16 %v1878_v24, %v280_v13  ;;  %v1413_v44 = vpack.i.bf16 %v1856_v3, %v1874_v21  ;;  %v295_v46 = vunpack.c.l.bf16 %v275_v45  ;;  %s811_s9 = scalar_lea.vmem %s2164_s1, %s1171_s6 }
  0x31   : > { %1339 = vrot.lane.b32.xlu1 %v1872_v20, %s1716_s27  ;;  %300 = vst.msk [vmem:[#allocation3 + $0x8] sm:$0xff] %vm298_vm0, %v280_v13  ;;  %301 = vst.msk [vmem:[#allocation3 + $0x10] sm:$0xff] %vm298_vm0, %v1878_v24  ;;  %v1418_v43 = vpack.i.bf16 %v294_v41, %v1887_v30  ;;  %v1508_v48 = vpack.i.bf16 %v1887_v30, %v1893_v33  ;;  %v296_v49 = vunpack.c.h.bf16 %v274_v39  ;;  %v297_v52 = vunpack.c.l.bf16 %v277_v51  ;;  %v1603_v54 = vld [vmem:[%s811_s9 + $0x10] ss:$0 sps:$4 sm:$0x33]   ;;  %v1604_v56 = vld [vmem:[%s811_s9 + $0x8] sm:$0xff]  }
  0x32   : > { %1329 = vrot.lane.b32.xlu0 %v1876_v23, %s1716_s27  ;;  %302 = vst.msk [vmem:[#allocation3 + $0x18] sm:$0xff] %vm298_vm0, %v1874_v21  ;;  %304 = vst.msk [vmem:[#allocation3 + $0x28] sm:$0xff] %vm298_vm0, %v1861_v8  ;;  %v1458_v47 = vpack.i.bf16 %v295_v46, %v294_v41  ;;  %vm845_vm1 = vcmask 1041408   ;;  %v1605_v57 = vld [vmem:[%s811_s9] sm:$0xff]   ;;  %vm371_vm2 = vcmask 64545   ;;  %vm373_vm3 = vcmask 57376  }
  0x33   : > { %305 = vst.msk [vmem:[#allocation3 + $0x30] sm:$0xff] %vm298_vm0, %v1893_v33  ;;  %306 = vst.msk [vmem:[#allocation3 + $0x38] sm:$0xff] %vm298_vm0, %v1887_v30  ;;  %v1518_v50 = vpack.i.bf16 %v296_v49, %v294_v41  ;;  %v1558_v53 = vpack.i.bf16 %v297_v52, %v296_v49  ;;  %1199 = vmatprep.subr.msk.bf16.mxu0 %vm845_vm1, %v1603_v54  ;;  %v847_v55 = vsel %vm845_vm1, %v1603_v54, 0  ;;  %1200 = vmatprep.subr.msk.bf16.mxu1 %vm845_vm1, %v1603_v54  ;;  %vm437_vm4 = vcmask 97346  }
  0x34   : > { %1180 = vmatpush3.bf16.msra.mxu0 %v847_v55  ;;  %1196 = vmatpush3.bf16.msra.mxu1 %v847_v55  ;;  %vm439_vm5 = vcmask 91200   ;;  %vm480_vm6 = vcmask 130144   ;;  %vm538_vm7 = vcmask 162945   ;;  %vm540_vm8 = vcmask 155776  }
  0x35   : > { %1349 = vrot.lane.b32.xlu1 %v1885_v29, %s1716_s27  ;;  %1181 = vmatprep.subr.bf16.mxu0 %v1604_v56  ;;  %vm604_vm9 = vcmask 195746   ;;  %vm606_vm10 = vcmask 189600   ;;  %vm647_vm11 = vcmask 228544   ;;  %vm705_vm12 = vcmask 261345  }
  0x36   : > { %1344 = vrot.lane.b32.xlu0 %v1891_v32, %s1716_s27  ;;  %1194 = vmatprep.subr.bf16.mxu1 %v1604_v56  ;;  %vm707_vm13 = vcmask 254176   ;;  %vm771_vm14 = vcmask 294146   ;;  %vm773_vm15 = vcmask 288000   ;;  %vm832_vm0 = vcmask 293888  }
  0x38   : > { %1182 = vmatpush3.bf16.msra.mxu0 %v1604_v56  ;;  %1197 = vmatpush3.bf16.msra.mxu1 %v1604_v56 }
  0x39   : > { %1359 = vrot.lane.b32.xlu1 %v1897_v35, %s1716_s27  ;;  %1183 = vmatprep.subr.bf16.mxu0 %v1605_v57 }
  0x3a   : > { %1354 = vrot.lane.b32.xlu0 %v1901_v36, %s1716_s27  ;;  %1195 = vmatprep.subr.bf16.mxu1 %v1605_v57 }
  0x3c   : > { %1184 = vmatpush3.bf16.msra.mxu0 %v1605_v57  ;;  %1198 = vmatpush3.bf16.msra.mxu1 %v1605_v57 }
  0x3d   : > { %1369 = vrot.lane.b32.xlu1 %v1876_v23, %s1717_s11 }
  0x3e   : > { %1364 = vrot.lane.b32.xlu0 %v1323_v19, %s1717_s11 }
  0x41   : > { %1379 = vrot.lane.b32.xlu1 %v1872_v20, %s1717_s11 }
  0x42   : > { %1374 = vrot.lane.b32.xlu0 %v1867_v16, %s1717_s11 }
  0x45   : > { %1389 = vrot.lane.b32.xlu1 %v1885_v29, %s1717_s11 }
  0x46   : > { %1384 = vrot.lane.b32.xlu0 %v1891_v32, %s1717_s11 }
  0x49   : > { %1399 = vrot.lane.b32.xlu1 %v1897_v35, %s1717_s11 }
  0x4a   : > { %1394 = vrot.lane.b32.xlu0 %v1901_v36, %s1717_s11 }
  0x4d   : > { %1409 = vrot.lane.b32.xlu1 %v1408_v40, %s1718_s12 }
  0x4e   : > { %1404 = vrot.lane.b32.xlu0 %v1403_v42, %s1718_s12 }
  0x51   : > { %1419 = vrot.lane.b32.xlu1 %v1418_v43, %s1718_s12 }
  0x52   : > { %1414 = vrot.lane.b32.xlu0 %v1413_v44, %s1718_s12 }
  0x55   : > { %1429 = vrot.lane.b32.xlu1 %v1891_v32, %s1719_s13 }
  0x56   : > { %1424 = vrot.lane.b32.xlu0 %v1876_v23, %s1719_s13 }
  0x59   : > { %1439 = vrot.lane.b32.xlu1 %v1901_v36, %s1719_s13 }
  0x5a   : > { %1434 = vrot.lane.b32.xlu0 %v1872_v20, %s1719_s13 }
  0x5d   : > { %1449 = vrot.lane.b32.xlu1 %v1867_v16, %s1719_s13 }
  0x5e   : > { %1444 = vrot.lane.b32.xlu0 %v1885_v29, %s1719_s13 }
  0x61   : > { %1459 = vrot.lane.b32.xlu1 %v1458_v47, %s1719_s13 }
  0x62   : > { %1454 = vrot.lane.b32.xlu0 %v1897_v35, %s1719_s13 }
  0x65   : > { %1469 = vrot.lane.b32.xlu1 %v1891_v32, %s1720_s14 }
  0x66   : > { %1464 = vrot.lane.b32.xlu0 %v1876_v23, %s1720_s14 }
  0x69   : > { %1479 = vrot.lane.b32.xlu1 %v1901_v36, %s1720_s14 }
  0x6a   : > { %1474 = vrot.lane.b32.xlu0 %v1872_v20, %s1720_s14 }
  0x6d   : > { %1489 = vrot.lane.b32.xlu1 %v1867_v16, %s1720_s14 }
  0x6e   : > { %1484 = vrot.lane.b32.xlu0 %v1885_v29, %s1720_s14 }
  0x71   : > { %1499 = vrot.lane.b32.xlu1 %v1458_v47, %s1720_s14 }
  0x72   : > { %1494 = vrot.lane.b32.xlu0 %v1897_v35, %s1720_s14 }
  0x75   : > { %1509 = vrot.lane.b32.xlu1 %v1508_v48, %s1721_s25 }
  0x76   : > { %1504 = vrot.lane.b32.xlu0 %v1503_v37, %s1721_s25 }
  0x79   : > { %1519 = vrot.lane.b32.xlu1 %v1518_v50, %s1721_s25 }
  0x7a   : > { %1514 = vrot.lane.b32.xlu0 %v1513_v38, %s1721_s25 }
  0x7d   : > { %1529 = vrot.lane.b32.xlu1 %v1885_v29, %s1722_s26 }
  0x7e   : > { %1524 = vrot.lane.b32.xlu0 %v1891_v32, %s1722_s26 }
  0x81   : > { %1539 = vrot.lane.b32.xlu1 %v1897_v35, %s1722_s26 }
  0x82   : > { %1534 = vrot.lane.b32.xlu0 %v1901_v36, %s1722_s26 }
  0x85   : > { %1549 = vrot.lane.b32.xlu1 %v1872_v20, %s1722_s26 }
  0x86   : > { %1544 = vrot.lane.b32.xlu0 %v1867_v16, %s1722_s26 }
  0x89   : > { %1559 = vrot.lane.b32.xlu1 %v1558_v53, %s1722_s26 }
  0x8a   : > { %1554 = vrot.lane.b32.xlu0 %v1458_v47, %s1722_s26 }
  0x8d   : > { %1569 = vrot.lane.b32.xlu1 %v1885_v29, %s1723_s29 }
  0x8e   : > { %1564 = vrot.lane.b32.xlu0 %v1891_v32, %s1723_s29 }
  0x91   : > { %1579 = vrot.lane.b32.xlu1 %v1897_v35, %s1723_s29 }
  0x92   : > { %1574 = vrot.lane.b32.xlu0 %v1901_v36, %s1723_s29 }
  0x95   : > { %1589 = vrot.lane.b32.xlu1 %v1872_v20, %s1723_s29 }
  0x96   : > { %1584 = vrot.lane.b32.xlu0 %v1867_v16, %s1723_s29 }
  0x99   : > { %1599 = vrot.lane.b32.xlu1 %v1558_v53, %s1723_s29 }
  0x9a   : > { %1594 = vrot.lane.b32.xlu0 %v1458_v47, %s1723_s29 }
  0x9f   : > { %v1335_v58 = vpop.permute.xlu1 %1334 }
  0xa0   : > { %v1337_v59 = vunpack.i.h.bf16 %v1335_v58  ;;  %v1336_v60 = vunpack.i.l.bf16 %v1335_v58  ;;  %v1325_v61 = vpop.permute.xlu0 %1324 }
  0xa1   : > { %v1327_v62 = vunpack.i.h.bf16 %v1325_v61  ;;  %v1326_v63 = vunpack.i.l.bf16 %v1325_v61 }
  0xa2   : > { %381 = vst.msk [vmem:[#allocation3 + $0x1f] sm:$0xfe] %vm371_vm2, %v1336_v60 }
  0xa3   : > { %382 = vst.msk [vmem:[#allocation3 + $0x27] sm:$0x1] %vm373_vm3, %v1337_v59  ;;  %374 = vst.msk [vmem:[#allocation3 + $0x7] sm:$0x1] %vm373_vm3, %v1327_v62  ;;  %v1340_v0 = vpop.permute.xlu1 %1339 }
  0xa4   : > { %372 = vst.msk [vmem:[#allocation3 - $0x1] sm:$0xfe] %vm371_vm2, %v1326_v63  ;;  %v1342_v1 = vunpack.i.h.bf16 %v1340_v0  ;;  %v1341_v2 = vunpack.i.l.bf16 %v1340_v0  ;;  %v1330_v3 = vpop.permute.xlu0 %1329 }
  0xa5   : > { %v1332_v4 = vunpack.i.h.bf16 %v1330_v3  ;;  %v1331_v5 = vunpack.i.l.bf16 %v1330_v3 }
  0xa6   : > { %384 = vst.msk [vmem:[#allocation3 + $0x2f] sm:$0x1] %vm373_vm3, %v1342_v1 }
  0xa7   : > { %383 = vst.msk [vmem:[#allocation3 + $0x27] sm:$0xfe] %vm371_vm2, %v1341_v2  ;;  %375 = vst.msk [vmem:[#allocation3 + $0x7] sm:$0xfe] %vm371_vm2, %v1331_v5  ;;  %v1350_v6 = vpop.permute.xlu1 %1349 }
  0xa8   : > { %376 = vst.msk [vmem:[#allocation3 + $0xf] sm:$0x1] %vm373_vm3, %v1332_v4  ;;  %v1352_v7 = vunpack.i.h.bf16 %v1350_v6  ;;  %v1351_v8 = vunpack.i.l.bf16 %v1350_v6  ;;  %v1345_v9 = vpop.permute.xlu0 %1344 }
  0xa9   : > { %v1347_v10 = vunpack.i.h.bf16 %v1345_v9  ;;  %v1346_v11 = vunpack.i.l.bf16 %v1345_v9 }
  0xaa   : > { %379 = vst.msk [vmem:[#allocation3 + $0x17] sm:$0xfe] %vm371_vm2, %v1351_v8 }
  0xab   : > { %380 = vst.msk [vmem:[#allocation3 + $0x1f] sm:$0x1] %vm373_vm3, %v1352_v7  ;;  %378 = vst.msk [vmem:[#allocation3 + $0x17] sm:$0x1] %vm373_vm3, %v1347_v10  ;;  %v1360_v12 = vpop.permute.xlu1 %1359 }
  0xac   : > { %377 = vst.msk [vmem:[#allocation3 + $0xf] sm:$0xfe] %vm371_vm2, %v1346_v11  ;;  %v1362_v13 = vunpack.i.h.bf16 %v1360_v12  ;;  %v1361_v14 = vunpack.i.l.bf16 %v1360_v12  ;;  %v1355_v15 = vpop.permute.xlu0 %1354 }
  0xad   : > { %v1357_v16 = vunpack.i.h.bf16 %v1355_v15  ;;  %v1356_v17 = vunpack.i.l.bf16 %v1355_v15 }
  0xae   : > { %388 = vst.msk [vmem:[#allocation3 + $0x3f] sm:$0x1] %vm373_vm3, %v1362_v13 }
  0xaf   : > { %387 = vst.msk [vmem:[#allocation3 + $0x37] sm:$0xfe] %vm371_vm2, %v1361_v14  ;;  %385 = vst.msk [vmem:[#allocation3 + $0x2f] sm:$0xfe] %vm371_vm2, %v1356_v17  ;;  %v1370_v18 = vpop.permute.xlu1 %1369 }
  0xb0   : > { %386 = vst.msk [vmem:[#allocation3 + $0x37] sm:$0x1] %vm373_vm3, %v1357_v16  ;;  %v1372_v19 = vunpack.i.h.bf16 %v1370_v18  ;;  %v1371_v20 = vunpack.i.l.bf16 %v1370_v18  ;;  %v1365_v21 = vpop.permute.xlu0 %1364 }
  0xb1   : > { %v1367_v22 = vunpack.i.h.bf16 %v1365_v21  ;;  %v1366_v23 = vunpack.i.l.bf16 %v1365_v21 }
  0xb2   : > { %441 = vst.msk [vmem:[#allocation3 + $0x6] sm:$0xfc] %vm437_vm4, %v1371_v20 }
  0xb3   : > { %442 = vst.msk [vmem:[#allocation3 + $0xe] sm:$0x3] %vm439_vm5, %v1372_v19  ;;  %440 = vst.msk [vmem:[#allocation3 + $0x6] sm:$0x3] %vm439_vm5, %v1367_v22  ;;  %v1380_v24 = vpop.permute.xlu1 %1379 }
  0xb4   : > { %438 = vst.msk [vmem:[#allocation3 - $0x2] sm:$0xfc] %vm437_vm4, %v1366_v23  ;;  %v1382_v25 = vunpack.i.h.bf16 %v1380_v24  ;;  %v1381_v26 = vunpack.i.l.bf16 %v1380_v24  ;;  %v1375_v27 = vpop.permute.xlu0 %1374 }
  0xb5   : > { %v1377_v28 = vunpack.i.h.bf16 %v1375_v27  ;;  %v1376_v29 = vunpack.i.l.bf16 %v1375_v27 }
  0xb6   : > { %450 = vst.msk [vmem:[#allocation3 + $0x2e] sm:$0x3] %vm439_vm5, %v1382_v25 }
  0xb7   : > { %449 = vst.msk [vmem:[#allocation3 + $0x26] sm:$0xfc] %vm437_vm4, %v1381_v26  ;;  %447 = vst.msk [vmem:[#allocation3 + $0x1e] sm:$0xfc] %vm437_vm4, %v1376_v29  ;;  %v1390_v30 = vpop.permute.xlu1 %1389 }
  0xb8   : > { %448 = vst.msk [vmem:[#allocation3 + $0x26] sm:$0x3] %vm439_vm5, %v1377_v28  ;;  %v1392_v31 = vunpack.i.h.bf16 %v1390_v30  ;;  %v1391_v32 = vunpack.i.l.bf16 %v1390_v30  ;;  %v1385_v33 = vpop.permute.xlu0 %1384 }
  0xb9   : > { %v1387_v34 = vunpack.i.h.bf16 %v1385_v33  ;;  %v1386_v35 = vunpack.i.l.bf16 %v1385_v33 }
  0xba   : > { %446 = vst.msk [vmem:[#allocation3 + $0x1e] sm:$0x3] %vm439_vm5, %v1392_v31 }
  0xbb   : > { %445 = vst.msk [vmem:[#allocation3 + $0x16] sm:$0xfc] %vm437_vm4, %v1391_v32  ;;  %443 = vst.msk [vmem:[#allocation3 + $0xe] sm:$0xfc] %vm437_vm4, %v1386_v35  ;;  %v1400_v36 = vpop.permute.xlu1 %1399 }
  0xbc   : > { %444 = vst.msk [vmem:[#allocation3 + $0x16] sm:$0x3] %vm439_vm5, %v1387_v34  ;;  %v1402_v37 = vunpack.i.h.bf16 %v1400_v36  ;;  %v1401_v38 = vunpack.i.l.bf16 %v1400_v36  ;;  %v1395_v39 = vpop.permute.xlu0 %1394 }
  0xbd   : > { %v1397_v40 = vunpack.i.h.bf16 %v1395_v39  ;;  %v1396_v41 = vunpack.i.l.bf16 %v1395_v39 }
  0xbe   : > { %454 = vst.msk [vmem:[#allocation3 + $0x3e] sm:$0x3] %vm439_vm5, %v1402_v37 }
  0xbf   : > { %453 = vst.msk [vmem:[#allocation3 + $0x36] sm:$0xfc] %vm437_vm4, %v1401_v38  ;;  %451 = vst.msk [vmem:[#allocation3 + $0x2e] sm:$0xfc] %vm437_vm4, %v1396_v41  ;;  %v1410_v42 = vpop.permute.xlu1 %1409 }
  0xc0   : > { %452 = vst.msk [vmem:[#allocation3 + $0x36] sm:$0x3] %vm439_vm5, %v1397_v40  ;;  %v1412_v43 = vunpack.i.h.bf16 %v1410_v42  ;;  %v1411_v44 = vunpack.i.l.bf16 %v1410_v42  ;;  %v1405_v45 = vpop.permute.xlu0 %1404 }
  0xc1   : > { %v1407_v46 = vunpack.i.h.bf16 %v1405_v45  ;;  %v1406_v47 = vunpack.i.l.bf16 %v1405_v45 }
  0xc2   : > { %485 = vst.msk [vmem:[#allocation3 + $0x20] sm:$0xff] %vm480_vm6, %v1411_v44  ;;  %486 = vst.msk [vmem:[#allocation3 + $0x28] sm:$0xff] %vm480_vm6, %v1412_v43 }
  0xc3   : > { %v1420_v48 = vpop.permute.xlu1 %1419  ;;  %482 = vst.msk [vmem:[#allocation3 + $0x8] sm:$0xff] %vm480_vm6, %v1407_v46  ;;  %481 = vst.msk [vmem:[#allocation3] sm:$0xff] %vm480_vm6, %v1406_v47 }
  0xc4   : > { %v1422_v49 = vunpack.i.h.bf16 %v1420_v48  ;;  %v1421_v50 = vunpack.i.l.bf16 %v1420_v48  ;;  %v1415_v51 = vpop.permute.xlu0 %1414 }
  0xc5   : > { %v1417_v52 = vunpack.i.h.bf16 %v1415_v51  ;;  %v1416_v53 = vunpack.i.l.bf16 %v1415_v51 }
  0xc6   : > { %487 = vst.msk [vmem:[#allocation3 + $0x30] sm:$0xff] %vm480_vm6, %v1421_v50  ;;  %488 = vst.msk [vmem:[#allocation3 + $0x38] sm:$0xff] %vm480_vm6, %v1422_v49 }
  0xc7   : > { %v1430_v54 = vpop.permute.xlu1 %1429  ;;  %483 = vst.msk [vmem:[#allocation3 + $0x10] sm:$0xff] %vm480_vm6, %v1416_v53  ;;  %484 = vst.msk [vmem:[#allocation3 + $0x18] sm:$0xff] %vm480_vm6, %v1417_v52 }
  0xc8   : > { %v1432_v55 = vunpack.i.h.bf16 %v1430_v54  ;;  %v1431_v56 = vunpack.i.l.bf16 %v1430_v54  ;;  %v1425_v57 = vpop.permute.xlu0 %1424 }
  0xc9   : > { %v1427_v58 = vunpack.i.h.bf16 %v1425_v57  ;;  %v1426_v59 = vunpack.i.l.bf16 %v1425_v57 }
  0xca   : > { %542 = vst.msk [vmem:[#allocation3 + $0x7] sm:$0xfe] %vm538_vm7, %v1431_v56 }
  0xcb   : > { %543 = vst.msk [vmem:[#allocation3 + $0xf] sm:$0x1] %vm540_vm8, %v1432_v55  ;;  %541 = vst.msk [vmem:[#allocation3 + $0x7] sm:$0x1] %vm540_vm8, %v1427_v58  ;;  %v1440_v60 = vpop.permute.xlu1 %1439 }
  0xcc   : > { %539 = vst.msk [vmem:[#allocation3 - $0x1] sm:$0xfe] %vm538_vm7, %v1426_v59  ;;  %v1442_v61 = vunpack.i.h.bf16 %v1440_v60  ;;  %v1441_v62 = vunpack.i.l.bf16 %v1440_v60  ;;  %v1435_v63 = vpop.permute.xlu0 %1434 }
  0xcd   : > { %v1437_v0 = vunpack.i.h.bf16 %v1435_v63  ;;  %v1436_v1 = vunpack.i.l.bf16 %v1435_v63 }
  0xce   : > { %550 = vst.msk [vmem:[#allocation3 + $0x27] sm:$0xfe] %vm538_vm7, %v1441_v62 }
  0xcf   : > { %551 = vst.msk [vmem:[#allocation3 + $0x2f] sm:$0x1] %vm540_vm8, %v1442_v61  ;;  %549 = vst.msk [vmem:[#allocation3 + $0x27] sm:$0x1] %vm540_vm8, %v1437_v0  ;;  %v1450_v2 = vpop.permute.xlu1 %1449 }
  0xd0   : > { %548 = vst.msk [vmem:[#allocation3 + $0x1f] sm:$0xfe] %vm538_vm7, %v1436_v1  ;;  %v1452_v3 = vunpack.i.h.bf16 %v1450_v2  ;;  %v1451_v4 = vunpack.i.l.bf16 %v1450_v2  ;;  %v1445_v5 = vpop.permute.xlu0 %1444 }
  0xd1   : > { %v1447_v6 = vunpack.i.h.bf16 %v1445_v5  ;;  %v1446_v7 = vunpack.i.l.bf16 %v1445_v5 }
  0xd2   : > { %546 = vst.msk [vmem:[#allocation3 + $0x17] sm:$0xfe] %vm538_vm7, %v1451_v4 }
  0xd3   : > { %547 = vst.msk [vmem:[#allocation3 + $0x1f] sm:$0x1] %vm540_vm8, %v1452_v3  ;;  %545 = vst.msk [vmem:[#allocation3 + $0x17] sm:$0x1] %vm540_vm8, %v1447_v6  ;;  %v1460_v8 = vpop.permute.xlu1 %1459 }
  0xd4   : > { %544 = vst.msk [vmem:[#allocation3 + $0xf] sm:$0xfe] %vm538_vm7, %v1446_v7  ;;  %v1462_v9 = vunpack.i.h.bf16 %v1460_v8  ;;  %v1461_v10 = vunpack.i.l.bf16 %v1460_v8  ;;  %v1455_v11 = vpop.permute.xlu0 %1454 }
  0xd5   : > { %v1457_v12 = vunpack.i.h.bf16 %v1455_v11  ;;  %v1456_v13 = vunpack.i.l.bf16 %v1455_v11 }
  0xd6   : > { %554 = vst.msk [vmem:[#allocation3 + $0x37] sm:$0xfe] %vm538_vm7, %v1461_v10 }
  0xd7   : > { %555 = vst.msk [vmem:[#allocation3 + $0x3f] sm:$0x1] %vm540_vm8, %v1462_v9  ;;  %553 = vst.msk [vmem:[#allocation3 + $0x37] sm:$0x1] %vm540_vm8, %v1457_v12  ;;  %v1470_v14 = vpop.permute.xlu1 %1469 }
  0xd8   : > { %552 = vst.msk [vmem:[#allocation3 + $0x2f] sm:$0xfe] %vm538_vm7, %v1456_v13  ;;  %v1472_v15 = vunpack.i.h.bf16 %v1470_v14  ;;  %v1471_v16 = vunpack.i.l.bf16 %v1470_v14  ;;  %v1465_v17 = vpop.permute.xlu0 %1464 }
  0xd9   : > { %v1467_v18 = vunpack.i.h.bf16 %v1465_v17  ;;  %v1466_v19 = vunpack.i.l.bf16 %v1465_v17 }
  0xda   : > { %608 = vst.msk [vmem:[#allocation3 + $0x6] sm:$0xfc] %vm604_vm9, %v1471_v16 }
  0xdb   : > { %609 = vst.msk [vmem:[#allocation3 + $0xe] sm:$0x3] %vm606_vm10, %v1472_v15  ;;  %607 = vst.msk [vmem:[#allocation3 + $0x6] sm:$0x3] %vm606_vm10, %v1467_v18  ;;  %v1480_v20 = vpop.permute.xlu1 %1479 }
  0xdc   : > { %605 = vst.msk [vmem:[#allocation3 - $0x2] sm:$0xfc] %vm604_vm9, %v1466_v19  ;;  %v1482_v21 = vunpack.i.h.bf16 %v1480_v20  ;;  %v1481_v22 = vunpack.i.l.bf16 %v1480_v20  ;;  %v1475_v23 = vpop.permute.xlu0 %1474 }
  0xdd   : > { %v1477_v24 = vunpack.i.h.bf16 %v1475_v23  ;;  %v1476_v25 = vunpack.i.l.bf16 %v1475_v23 }
  0xde   : > { %616 = vst.msk [vmem:[#allocation3 + $0x26] sm:$0xfc] %vm604_vm9, %v1481_v22 }
  0xdf   : > { %617 = vst.msk [vmem:[#allocation3 + $0x2e] sm:$0x3] %vm606_vm10, %v1482_v21  ;;  %615 = vst.msk [vmem:[#allocation3 + $0x26] sm:$0x3] %vm606_vm10, %v1477_v24  ;;  %v1490_v26 = vpop.permute.xlu1 %1489 }
  0xe0   : > { %614 = vst.msk [vmem:[#allocation3 + $0x1e] sm:$0xfc] %vm604_vm9, %v1476_v25  ;;  %v1492_v27 = vunpack.i.h.bf16 %v1490_v26  ;;  %v1491_v28 = vunpack.i.l.bf16 %v1490_v26  ;;  %v1485_v29 = vpop.permute.xlu0 %1484 }
  0xe1   : > { %v1487_v30 = vunpack.i.h.bf16 %v1485_v29  ;;  %v1486_v31 = vunpack.i.l.bf16 %v1485_v29 }
  0xe2   : > { %612 = vst.msk [vmem:[#allocation3 + $0x16] sm:$0xfc] %vm604_vm9, %v1491_v28 }
  0xe3   : > { %613 = vst.msk [vmem:[#allocation3 + $0x1e] sm:$0x3] %vm606_vm10, %v1492_v27  ;;  %611 = vst.msk [vmem:[#allocation3 + $0x16] sm:$0x3] %vm606_vm10, %v1487_v30  ;;  %v1500_v32 = vpop.permute.xlu1 %1499 }
  0xe4   : > { %610 = vst.msk [vmem:[#allocation3 + $0xe] sm:$0xfc] %vm604_vm9, %v1486_v31  ;;  %v1502_v33 = vunpack.i.h.bf16 %v1500_v32  ;;  %v1501_v34 = vunpack.i.l.bf16 %v1500_v32  ;;  %v1495_v35 = vpop.permute.xlu0 %1494 }
  0xe5   : > { %v1497_v36 = vunpack.i.h.bf16 %v1495_v35  ;;  %v1496_v37 = vunpack.i.l.bf16 %v1495_v35 }
  0xe6   : > { %620 = vst.msk [vmem:[#allocation3 + $0x36] sm:$0xfc] %vm604_vm9, %v1501_v34 }
  0xe7   : > { %621 = vst.msk [vmem:[#allocation3 + $0x3e] sm:$0x3] %vm606_vm10, %v1502_v33  ;;  %619 = vst.msk [vmem:[#allocation3 + $0x36] sm:$0x3] %vm606_vm10, %v1497_v36  ;;  %v1510_v38 = vpop.permute.xlu1 %1509 }
  0xe8   : > { %618 = vst.msk [vmem:[#allocation3 + $0x2e] sm:$0xfc] %vm604_vm9, %v1496_v37  ;;  %v1512_v39 = vunpack.i.h.bf16 %v1510_v38  ;;  %v1511_v40 = vunpack.i.l.bf16 %v1510_v38  ;;  %v1505_v41 = vpop.permute.xlu0 %1504 }
  0xe9   : > { %v1507_v42 = vunpack.i.h.bf16 %v1505_v41  ;;  %v1506_v43 = vunpack.i.l.bf16 %v1505_v41 }
  0xea   : > { %652 = vst.msk [vmem:[#allocation3 + $0x20] sm:$0xff] %vm647_vm11, %v1511_v40  ;;  %653 = vst.msk [vmem:[#allocation3 + $0x28] sm:$0xff] %vm647_vm11, %v1512_v39 }
  0xeb   : > { %v1520_v44 = vpop.permute.xlu1 %1519  ;;  %649 = vst.msk [vmem:[#allocation3 + $0x8] sm:$0xff] %vm647_vm11, %v1507_v42  ;;  %648 = vst.msk [vmem:[#allocation3] sm:$0xff] %vm647_vm11, %v1506_v43 }
  0xec   : > { %v1522_v45 = vunpack.i.h.bf16 %v1520_v44  ;;  %v1521_v46 = vunpack.i.l.bf16 %v1520_v44  ;;  %v1515_v47 = vpop.permute.xlu0 %1514 }
  0xed   : > { %v1517_v48 = vunpack.i.h.bf16 %v1515_v47  ;;  %v1516_v49 = vunpack.i.l.bf16 %v1515_v47 }
  0xee   : > { %654 = vst.msk [vmem:[#allocation3 + $0x30] sm:$0xff] %vm647_vm11, %v1521_v46  ;;  %655 = vst.msk [vmem:[#allocation3 + $0x38] sm:$0xff] %vm647_vm11, %v1522_v45  ;;  %v803_v46 = vld [vmem:[#allocation2 + $0x18] sm:$0xff] }
  0xef   : > { %v1530_v50 = vpop.permute.xlu1 %1529  ;;  %650 = vst.msk [vmem:[#allocation3 + $0x10] sm:$0xff] %vm647_vm11, %v1516_v49  ;;  %651 = vst.msk [vmem:[#allocation3 + $0x18] sm:$0xff] %vm647_vm11, %v1517_v48  ;;  %v801_v48 = vld [vmem:[#allocation2 + $0x30] sm:$0xff] }
  0xf0   : > { %v1532_v51 = vunpack.i.h.bf16 %v1530_v50  ;;  %v1531_v52 = vunpack.i.l.bf16 %v1530_v50  ;;  %v1525_v53 = vpop.permute.xlu0 %1524 }
  0xf1   : > { %v1527_v54 = vunpack.i.h.bf16 %v1525_v53  ;;  %v1526_v55 = vunpack.i.l.bf16 %v1525_v53 }
  0xf2   : > { %709 = vst.msk [vmem:[#allocation3 + $0x7] sm:$0xfe] %vm705_vm12, %v1531_v52  ;;  %v807_v52 = vld [vmem:[#allocation2 + $0x28] sm:$0xff] }
  0xf3   : > { %710 = vst.msk [vmem:[#allocation3 + $0xf] sm:$0x1] %vm707_vm13, %v1532_v51  ;;  %708 = vst.msk [vmem:[#allocation3 + $0x7] sm:$0x1] %vm707_vm13, %v1527_v54  ;;  %v1540_v56 = vpop.permute.xlu1 %1539  ;;  %v804_v51 = vld [vmem:[#allocation2 + $0x10] sm:$0xff] }
  0xf4   : > { %706 = vst.msk [vmem:[#allocation3 - $0x1] sm:$0xfe] %vm705_vm12, %v1526_v55  ;;  %v1542_v57 = vunpack.i.h.bf16 %v1540_v56  ;;  %v1541_v58 = vunpack.i.l.bf16 %v1540_v56  ;;  %v1535_v59 = vpop.permute.xlu0 %1534  ;;  %v802_v56 = vld [vmem:[#allocation2] sm:$0xff] }
  0xf5   : > { %v1537_v60 = vunpack.i.h.bf16 %v1535_v59  ;;  %v1536_v61 = vunpack.i.l.bf16 %v1535_v59 }
  0xf6   : > { %717 = vst.msk [vmem:[#allocation3 + $0x27] sm:$0xfe] %vm705_vm12, %v1541_v58 }
  0xf7   : > { %718 = vst.msk [vmem:[#allocation3 + $0x2f] sm:$0x1] %vm707_vm13, %v1542_v57  ;;  %716 = vst.msk [vmem:[#allocation3 + $0x27] sm:$0x1] %vm707_vm13, %v1537_v60  ;;  %v1550_v62 = vpop.permute.xlu1 %1549  ;;  %v805_v57 = vld [vmem:[#allocation2 + $0x8] sm:$0xff] }
  0xf8   : > { %715 = vst.msk [vmem:[#allocation3 + $0x1f] sm:$0xfe] %vm705_vm12, %v1536_v61  ;;  %v1552_v63 = vunpack.i.h.bf16 %v1550_v62  ;;  %v1551_v0 = vunpack.i.l.bf16 %v1550_v62  ;;  %v1545_v1 = vpop.permute.xlu0 %1544  ;;  %v808_v62 = vld [vmem:[#allocation2 + $0x38] sm:$0xff] }
  0xf9   : > { %v1547_v2 = vunpack.i.h.bf16 %v1545_v1  ;;  %v1546_v3 = vunpack.i.l.bf16 %v1545_v1 }
  0xfa   : > { %713 = vst.msk [vmem:[#allocation3 + $0x17] sm:$0xfe] %vm705_vm12, %v1551_v0 }
  0xfb   : > { %714 = vst.msk [vmem:[#allocation3 + $0x1f] sm:$0x1] %vm707_vm13, %v1552_v63  ;;  %712 = vst.msk [vmem:[#allocation3 + $0x17] sm:$0x1] %vm707_vm13, %v1547_v2  ;;  %v1560_v4 = vpop.permute.xlu1 %1559  ;;  %v806_v2 = vld [vmem:[#allocation2 + $0x20] sm:$0xff] }
  0xfc   : > { %711 = vst.msk [vmem:[#allocation3 + $0xf] sm:$0xfe] %vm705_vm12, %v1546_v3  ;;  %v1562_v5 = vunpack.i.h.bf16 %v1560_v4  ;;  %v1561_v6 = vunpack.i.l.bf16 %v1560_v4  ;;  %v1555_v7 = vpop.permute.xlu0 %1554 }
  0xfd   : > { %v1557_v8 = vunpack.i.h.bf16 %v1555_v7  ;;  %v1556_v9 = vunpack.i.l.bf16 %v1555_v7 }
  0xfe   : > { %721 = vst.msk [vmem:[#allocation3 + $0x37] sm:$0xfe] %vm705_vm12, %v1561_v6 }
  0xff   : > { %722 = vst.msk [vmem:[#allocation3 + $0x3f] sm:$0x1] %vm707_vm13, %v1562_v5  ;;  %720 = vst.msk [vmem:[#allocation3 + $0x37] sm:$0x1] %vm707_vm13, %v1557_v8  ;;  %v1570_v10 = vpop.permute.xlu1 %1569 }
 0x100   : > { %719 = vst.msk [vmem:[#allocation3 + $0x2f] sm:$0xfe] %vm705_vm12, %v1556_v9  ;;  %v1572_v11 = vunpack.i.h.bf16 %v1570_v10  ;;  %v1571_v12 = vunpack.i.l.bf16 %v1570_v10  ;;  %v1565_v13 = vpop.permute.xlu0 %1564 }
 0x101   : > { %v1567_v14 = vunpack.i.h.bf16 %v1565_v13  ;;  %v1566_v15 = vunpack.i.l.bf16 %v1565_v13 }
 0x102   : > { %775 = vst.msk [vmem:[#allocation3 + $0x6] sm:$0xfc] %vm771_vm14, %v1571_v12 }
 0x103   : > { %776 = vst.msk [vmem:[#allocation3 + $0xe] sm:$0x3] %vm773_vm15, %v1572_v11  ;;  %774 = vst.msk [vmem:[#allocation3 + $0x6] sm:$0x3] %vm773_vm15, %v1567_v14  ;;  %v1580_v16 = vpop.permute.xlu1 %1579 }
 0x104   : > { %772 = vst.msk [vmem:[#allocation3 - $0x2] sm:$0xfc] %vm771_vm14, %v1566_v15  ;;  %v1582_v17 = vunpack.i.h.bf16 %v1580_v16  ;;  %v1581_v18 = vunpack.i.l.bf16 %v1580_v16  ;;  %v1575_v19 = vpop.permute.xlu0 %1574 }
 0x105   : > { %v1577_v20 = vunpack.i.h.bf16 %v1575_v19  ;;  %v1576_v21 = vunpack.i.l.bf16 %v1575_v19 }
 0x106   : > { %783 = vst.msk [vmem:[#allocation3 + $0x26] sm:$0xfc] %vm771_vm14, %v1581_v18 }
 0x107   : > { %784 = vst.msk [vmem:[#allocation3 + $0x2e] sm:$0x3] %vm773_vm15, %v1582_v17  ;;  %782 = vst.msk [vmem:[#allocation3 + $0x26] sm:$0x3] %vm773_vm15, %v1577_v20  ;;  %v1590_v22 = vpop.permute.xlu1 %1589 }
 0x108   : > { %781 = vst.msk [vmem:[#allocation3 + $0x1e] sm:$0xfc] %vm771_vm14, %v1576_v21  ;;  %v1592_v23 = vunpack.i.h.bf16 %v1590_v22  ;;  %v1591_v24 = vunpack.i.l.bf16 %v1590_v22  ;;  %v1585_v25 = vpop.permute.xlu0 %1584 }
 0x109   : > { %v1587_v26 = vunpack.i.h.bf16 %v1585_v25  ;;  %v1586_v27 = vunpack.i.l.bf16 %v1585_v25 }
 0x10a   : > { %v790_v28 = vld [vmem:[#allocation3 + $0x8] sm:$0xff]  ;;  %779 = vst.msk [vmem:[#allocation3 + $0x16] sm:$0xfc] %vm771_vm14, %v1591_v24 }
 0x10b   : > { %780 = vst.msk [vmem:[#allocation3 + $0x1e] sm:$0x3] %vm773_vm15, %v1592_v23  ;;  %v789_v29 = vld [vmem:[#allocation3] sm:$0xff]  ;;  %778 = vst.msk [vmem:[#allocation3 + $0x16] sm:$0x3] %vm773_vm15, %v1587_v26  ;;  %v1600_v30 = vpop.permute.xlu1 %1599 }
 0x10c   : > { %777 = vst.msk [vmem:[#allocation3 + $0xe] sm:$0xfc] %vm771_vm14, %v1586_v27  ;;  %v797_v31 = vpack.c.bf16 %v790_v28, %v789_v29  ;;  %v1602_v32 = vunpack.i.h.bf16 %v1600_v30  ;;  %v1601_v33 = vunpack.i.l.bf16 %v1600_v30  ;;  %v1595_v34 = vpop.permute.xlu0 %1594 }
 0x10d   : > { %v1597_v35 = vunpack.i.h.bf16 %v1595_v34  ;;  %v1596_v36 = vunpack.i.l.bf16 %v1595_v34 }
 0x10e   : > { %1185 = vmatprep.mubr.msk.bf16.mxu0 %vm832_vm0, %v797_v31  ;;  %v794_v37 = vld [vmem:[#allocation3 + $0x28] sm:$0xff]  ;;  %787 = vst.msk [vmem:[#allocation3 + $0x36] sm:$0xfc] %vm771_vm14, %v1601_v33 }
 0x10f   : > { %788 = vst.msk [vmem:[#allocation3 + $0x3e] sm:$0x3] %vm773_vm15, %v1602_v32  ;;  %v793_v38 = vld [vmem:[#allocation3 + $0x20] sm:$0xff]  ;;  %786 = vst.msk [vmem:[#allocation3 + $0x36] sm:$0x3] %vm773_vm15, %v1597_v35 }
 0x110   : > { %785 = vst.msk [vmem:[#allocation3 + $0x2e] sm:$0xfc] %vm771_vm14, %v1596_v36  ;;  %v799_v39 = vpack.c.bf16 %v794_v37, %v793_v38 }
 0x112   : > { %1189 = vmatprep.mubr.msk.bf16.mxu1 %vm832_vm0, %v799_v39  ;;  %v792_v40 = vld [vmem:[#allocation3 + $0x18] sm:$0xff] }
 0x113   : > { %v791_v41 = vld [vmem:[#allocation3 + $0x10] sm:$0xff] }
 0x114   : > { %v798_v42 = vpack.c.bf16 %v792_v40, %v791_v41 }
 0x116   : > { %1186 = vmatmul.mubr.msk.bf16.vlgmr.msra.gmra.mxu0 %vm832_vm0, %v798_v42  ;;  %v796_v43 = vld [vmem:[#allocation3 + $0x38] sm:$0xff] }
 0x117   : > { %v795_v44 = vld [vmem:[#allocation3 + $0x30] sm:$0xff] }
 0x118   : > { %v800_v45 = vpack.c.bf16 %v796_v43, %v795_v44 }
 0x11a   : > { %1190 = vmatmul.mubr.msk.bf16.vlgmr.msra.gmra.mxu1 %vm832_vm0, %v800_v45 }
 0x1d6   : > { %v1187_v47 = vpop.f32.mrf.mxu0 }
 0x1d7   : > { %v916_v49 = vadd.f32 %v1187_v47, %v803_v46 }
 0x1d8   : > { %v883_v50 = vpop.f32.mrf.mxu0 }
 0x1d9   : > { %924 = vst [vmem:[#allocation2 + $0x18] sm:$0xff] %v916_v49  ;;  %v914_v53 = vadd.f32 %v883_v50, %v801_v48 }
 0x1da   : > { %v1188_v54 = vpop.f32.mrf.mxu0  ;;  %v1191_v55 = vpop.f32.mrf.mxu1 }
 0x1db   : > { %922 = vst [vmem:[#allocation2 + $0x30] sm:$0xff] %v914_v53  ;;  %v917_v58 = vadd.f32 %v1188_v54, %v804_v51  ;;  %v920_v59 = vadd.f32 %v1191_v55, %v807_v52 }
 0x1dc   : > { %v886_v60 = vpop.f32.mrf.mxu0  ;;  %v899_v61 = vpop.f32.mrf.mxu1 }
 0x1dd   : > { %925 = vst [vmem:[#allocation2 + $0x10] sm:$0xff] %v917_v58  ;;  %928 = vst [vmem:[#allocation2 + $0x28] sm:$0xff] %v920_v59  ;;  %v915_v63 = vadd.f32 %v886_v60, %v802_v56  ;;  %v918_v0 = vadd.f32 %v899_v61, %v805_v57 }
 0x1de   : > { %v1192_v1 = vpop.f32.mrf.mxu1 }
 0x1df   : > { %923 = vst [vmem:[#allocation2] sm:$0xff] %v915_v63  ;;  %926 = vst [vmem:[#allocation2 + $0x8] sm:$0xff] %v918_v0  ;;  %v921_v3 = vadd.f32 %v1192_v1, %v808_v62  ;;  %933 = sbr.rel (%p1139_p2) target bundleno = 502 (0x1f6), region = 44 }
 0x1e0   : > { %v902_v4 = vpop.f32.mrf.mxu1 }
 0x1e1   : > { %929 = vst [vmem:[#allocation2 + $0x38] sm:$0xff] %v921_v3  ;;  %v919_v5 = vadd.f32 %v902_v4, %v806_v2 }
 0x1e3   : > { %927 = vst [vmem:[#allocation2 + $0x20] sm:$0xff] %v919_v5 }
 0x1e4   : > { %v934_v6 = vld [vmem:[#allocation2 + $0x30] sm:$0xff]  ;;  %v936_v8 = vld [vmem:[#allocation2 + $0x18] sm:$0xff]  ;;  %v1140_v10 = vld [vmem:[%s2166_s3] ss:$0 sm:$0xff] }
 0x1e5   : > { %v937_v9 = vld [vmem:[#allocation2 + $0x10] sm:$0xff]  ;;  %v949_v12 = vmul.f32 %v1140_v10, %v934_v6  ;;  %v951_v14 = vmul.f32 %v1140_v10, %v936_v8  ;;  %v940_v17 = vld [vmem:[#allocation2 + $0x28] sm:$0xff] }
 0x1e6   : > { %v935_v7 = vld [vmem:[#allocation2] sm:$0xff]  ;;  %v938_v11 = vld [vmem:[#allocation2 + $0x8] sm:$0xff]  ;;  %v952_v15 = vmul.f32 %v1140_v10, %v937_v9  ;;  %v955_v21 = vmul.f32 %v1140_v10, %v940_v17 }
 0x1e7   : > { %v950_v13 = vmul.f32 %v1140_v10, %v935_v7  ;;  %v953_v19 = vmul.f32 %v1140_v10, %v938_v11  ;;  %v1149_v23 = vclampa-f32 %v949_v12, -128, 127  ;;  %v1153_v25 = vclampa-f32 %v951_v14, -128, 127 }
 0x1e8   : > { %v941_v18 = vld [vmem:[#allocation2 + $0x38] sm:$0xff]  ;;  %v1155_v26 = vclampa-f32 %v952_v15, -128, 127  ;;  %v1161_v32 = vclampa-f32 %v955_v21, -128, 127 }
 0x1e9   : > { %v956_v22 = vmul.f32 %v1140_v10, %v941_v18  ;;  %v1151_v24 = vclampa-f32 %v950_v13, -128, 127  ;;  %v1157_v27 = vclampa-f32 %v953_v19, -128, 127  ;;  %v1205_v29 = vcvt.f32.s32 %v1149_v23 }
 0x1ea   : > { %v939_v16 = vld [vmem:[#allocation2 + $0x20] sm:$0xff]  ;;  %v1211_v31 = vcvt.f32.s32 %v1153_v25  ;;  %v1214_v33 = vcvt.f32.s32 %v1155_v26  ;;  %v1223_v38 = vcvt.f32.s32 %v1161_v32 }
 0x1eb   : > { %v954_v20 = vmul.f32 %v1140_v10, %v939_v16  ;;  %v1208_v30 = vcvt.f32.s32 %v1151_v24  ;;  %v1217_v34 = vcvt.f32.s32 %v1157_v27  ;;  %v1163_v36 = vclampa-f32 %v956_v22, -128, 127 }
 0x1ec   : > { %v1006_v39 = vpack.c.b16 %v1214_v33, %v1211_v31 }
 0x1ed   : > { %v1159_v28 = vclampa-f32 %v954_v20, -128, 127  ;;  %v1005_v37 = vpack.c.b16 %v1208_v30, %v1205_v29  ;;  %v1226_v40 = vcvt.f32.s32 %v1163_v36 }
 0x1ef   : > { %v1220_v35 = vcvt.f32.s32 %v1159_v28  ;;  %v1007_v42 = vpack.c.b8 %v1006_v39, %v1005_v37  ;;  %v1009_v43 = vpack.c.b16 %v1226_v40, %v1223_v38 }
 0x1f1   : > { %v1008_v41 = vpack.c.b16 %v1220_v35, %v1217_v34  ;;  %1011 = vst [vmem:[%s1848_s28] sm:$0xff] %v1007_v42 }
 0x1f3   : > { %v1010_v44 = vpack.c.b8 %v1009_v43, %v1008_v41 }
 0x1f5   : > { %1012 = vst [vmem:[%s1848_s28 + $0x8] sm:$0xff] %v1010_v44 }
 0x1f6 PF: > { %s1166_s18 = sshll.u32 %s1694_s19, 1  ;;  %s1167_s13 = sshll.u32 %s1698_s20, 4 }
 0x1f7   : > { %s1029_s14 = sshll.u32 %s1848_s28, 4  ;;  %s1026_s25 = sadd.s32 %s1167_s13, %s1166_s18  ;;  %s2096_s14 = int_to_ptr.vmem [resolvable:$true] %s1029_s14 }
 0x1f8   : > { %s1168_s26 = sshll.u32 %s1026_s25, 7  ;;  %s2176_s9 = sand.u32 1, %s1682_s16  }
 0x1f9   : > { %s2101_s8 = scalar_lea.hbm %s2167_s4, %s1168_s26  ;;  %s2105_s29 = scalar_lea.sflag [#allocation5], %s2176_s9 }
 0x1fa   : > { %s1606_s27 = scalar_lea.vmem %s2096_s14, 256  ;;  %s1724_s19 = smov [#allocation4]  }
 0x1fb   : > { %p1607_p3 = scmp.ne.s32.totalorder %s2096_s14, %s1606_s27  ;;  %s1610_s20 = sshll.u32 %s1724_s19, 4  ;;  %s1611_s20 = int_to_ptr.vmem [resolvable:$false] %s1610_s20 }
 0x1fc   : > { %s1612_s28 = scalar_lea.vmem %s1611_s20, 512  ;;  %p1613_p8 = scmp.lt.s32.totalorder %s2096_s14, %s1611_s20 }
 0x1fd   : > { %p1608_p4 = pnand %p1607_p3, %p1813_p6  ;;  %p1614_p9 = scmp.lt.s32.totalorder %s1612_s28, %s1606_s27 }
 0x1ff   : > { %p1609_p5 = pneg %p1608_p4  ;;  %p1615_p10 = por %p1614_p9, %p1613_p8 }
 0x201   : > { %p1616_p11 = pnand %p1615_p10, %p1609_p5 }
 0x203   : > { %1619 = shalt.err (!%p1616_p11)
}
 0x204   : > { %s1620_s12 = scalar_lea.hbm %s2101_s8, 256  ;;  %s1624_s25 = scalar_lea.hbm %s2167_s4, 4096 }
 0x205   : > { %p1621_p12 = scmp.ne.s32.totalorder %s2101_s8, %s1620_s12  ;;  %p1625_p1 = scmp.lt.s32.totalorder %s2101_s8, %s2167_s4 }
 0x206   : > { %p1626_p2 = scmp.lt.s32.totalorder %s1624_s25, %s1620_s12 }
 0x207   : > { %p1622_p13 = pnand %p1621_p12, %p1813_p6 }
 0x208   : > { %p1627_p3 = por %p1626_p2, %p1625_p1 }
 0x209   : > { %p1623_p0 = pneg %p1622_p13 }
 0x20b   : > { %p1628_p4 = pnand %p1627_p3, %p1623_p0 }
 0x20d   : > { %1631 = shalt.err (!%p1628_p4)
}
 0x20e   : > { %s1725_s7 = smov 128  }
 0x20f   : > { %1227 = dma.vmem_to_hbm [thread:$0]  (%p1813_p6), %s2096_s14, 256, %s2101_s8, %s2105_s29, %s1725_s7, %s1725_s7, %s1717_s11  }
 0x210 PF: > { %p1233_p5 = scmp.ge.s32.totalorder %s1714_s24, 2  ;;  %s1044_s9 = sand.u32 1, %s1678_s15  }
 0x211   : > { %s1045_s27 = scalar_lea.sflag [#allocation5], %s1044_s9 }
 0x212   : > { %p1230_p8 = pnand %p1233_p5, %p1820_p7 }
 0x214   : > { %p1231_p9 = pneg %p1230_p8 }
 0x216   : > { %1673 = dma.done.wait (%p1231_p9), %s1045_s27, 256  }
 0x217   : > { %1675 = vsyncadd (%p1231_p9), %s1045_s27, 4294967040  ;;  %s17_s24 = sadd.s32 1, %s1714_s24   ;;  %s2177_s30 = sld [smem:[#allocation7_spill]] }
 0x218   : > { %p14_p10 = scmp.ge.s32.totalorder %s17_s24, 50   ;;  %s2178_s11 = sld [smem:[#allocation8_spill]] }
 0x219   : > { %s2179_s14 = sld [smem:[#allocation9_spill]]  ;;  %s2180_s15 = smov %s1682_s16 }
 0x21a   : > { %s2181_s16 = smov %s1686_s17  ;;  %s2182_s17 = smov %s1834_s10 }
 0x21b   : > { %s2183_s18 = smov %s1702_s21  ;;  %s2184_s19 = smov %s1706_s22 }
 0x21c   : > { %s2185_s20 = smov %s1710_s23  ;;  %16 = sbr.rel (!%p14_p10) target bundleno = 6 (0x6), region = 80 }
 0x21d   : > { %s2186_s21 = smov %s2177_s30 }
 0x21e   : > { %s2187_s22 = smov %s2178_s11 }
 0x21f   : > { %s2188_s23 = smov %s2179_s14 }
 0x221   :  { %1050 = vsyncpa [#allocation5], 1 }
 0x222   :  { %1052 = vsyncpa [#allocation5 + $0x1], 1 }

</bundles_post_ra>
